<compile_context>
chip_gen: v7x
topology: tpu7x:2x2x1
jax: 0.10.0
libtpu: 0.0.40
codegen_flags: <defaults>
</compile_context>

<pallas_src>
import functools

import jax
import jax.numpy as jnp
import numpy as np
from jax.experimental import pallas as pl
from jax.experimental.pallas import tpu as pltpu


def _elu(x):
    return jnp.where(x > 0, x, jnp.exp(jnp.minimum(x, 0.0)) - 1.0)


def _round_up(x, m):
    return ((x + m - 1) // m) * m


def _cdiv(a, b):
    return (a + b - 1) // b


# ---------------------------------------------------------------------------
# Shared per-row-tile forward compute.
#   e = ELU(h @ Wh + z @ Wz + es)         es already holds s @ Ws + bh+bz+bs
#   e = FCResBlock(e) ; e = FCResBlock(e) ; e = e @ Wp + bp
# MXU accumulation is always f32; ELU / bias adds are f32.
# ---------------------------------------------------------------------------
def _forward_tile(h_ref, z_ref, es_ref, wh_ref, wz_ref, w_res_ref, b_res_ref,
                  wp_ref, bp_ref, *, n_res):
    f32 = jnp.float32
    dot_dtype = wh_ref.dtype     # bf16 fast path (all chips) or f32 exact path

    e = jnp.dot(h_ref[...], wh_ref[...], preferred_element_type=f32)
    e = e + jnp.dot(z_ref[...], wz_ref[...], preferred_element_type=f32)
    e = _elu(e + es_ref[...])

    def res_block(e_in, base):
        cur = e_in
        for i in range(n_res):
            cur = jnp.dot(cur.astype(dot_dtype), w_res_ref[base + i],
                          preferred_element_type=f32) + b_res_ref[base + i]
            if i < n_res - 1:
                cur = _elu(cur)
        return _elu(cur + e_in)

    e = res_block(e, 0)
    e = res_block(e, n_res)

    e = jnp.dot(e.astype(dot_dtype), wp_ref[...],
                preferred_element_type=f32) + bp_ref[...]
    return e


# ---------------------------------------------------------------------------
# Fused path: forward + BatchNorm stats + normalization in one kernel.
# Output block = full (padded) array, resident in VMEM across the row grid.
# ---------------------------------------------------------------------------
def _fused_kernel(bn_ref, h_ref, z_ref, es_ref, wh_ref, wz_ref, w_res_ref,
                  b_res_ref, wp_ref, bp_ref, o_ref, acc1_ref, acc2_ref, *,
                  n_res, n_rows, row_tile, out_dim, has_pad, single_tile):
    t = pl.program_id(0)

    e = _forward_tile(h_ref, z_ref, es_ref, wh_ref, wz_ref, w_res_ref,
                      b_res_ref, wp_ref, bp_ref, n_res=n_res)

    if has_pad:
        # Mask padded rows out of the statistics (they still get stored and
        # are sliced off in the wrapper).
        ridx = t * row_tile + jax.lax.broadcasted_iota(jnp.int32, e.shape, 0)
        e_valid = jnp.where(ridx < n_rows, e, 0.0)
    else:
        e_valid = e

    n_el = jnp.float32(n_rows * out_dim)
    gamma = bn_ref[0]
    beta = bn_ref[1]

    if single_tile:
        # Everything in-register: no scratch accumulation, no dynamic stores.
        # NOTE: E[x^2]-E[x]^2 in f32 is cancellation-prone if |mean| >> std;
        # fine at this model's scale (post fc_params, pre-BN activations).
        total = jnp.sum(e_valid)
        total_sq = jnp.sum(e_valid * e_valid)
        mean = total / n_el
        var = jnp.maximum(total_sq / n_el - mean * mean, 0.0)
        rstd = jax.lax.rsqrt(var + 1e-3)
        scale = gamma * rstd
        shift = beta - mean * scale
        o_ref[...] = e * scale + shift
    else:
        @pl.when(t == 0)
        def _():
            acc1_ref[...] = jnp.zeros_like(acc1_ref)
            acc2_ref[...] = jnp.zeros_like(acc2_ref)

        # Per-lane partial sums accumulate across the sequential row grid.
        acc1_ref[...] += jnp.sum(e_valid, axis=0, keepdims=True)
        acc2_ref[...] += jnp.sum(e_valid * e_valid, axis=0, keepdims=True)

        # Stash the unnormalized tile into the resident full output block.
        row0 = pl.multiple_of(t * row_tile, 8)
        o_ref[pl.ds(row0, row_tile), :] = e

        @pl.when(t == pl.num_programs(0) - 1)
        def _():
            total = jnp.sum(acc1_ref[...], axis=1, keepdims=True)
            total_sq = jnp.sum(acc2_ref[...], axis=1, keepdims=True)
            mean = total / n_el
            var = jnp.maximum(total_sq / n_el - mean * mean, 0.0)
            rstd = jax.lax.rsqrt(var + 1e-3)
            scale = gamma * rstd
            shift = beta - mean * scale
            o_ref[...] = o_ref[...] * scale + shift


# ---------------------------------------------------------------------------
# Fallback pass 1 (only for very large row counts): forward + per-tile
# column partial sums; "parallel" row grid.
# ---------------------------------------------------------------------------
def _fwd_tile_kernel(h_ref, z_ref, es_ref, wh_ref, wz_ref, w_res_ref,
                     b_res_ref, wp_ref, bp_ref, e_ref, stats_ref, *,
                     n_res, n_rows, row_tile, has_pad):
    t = pl.program_id(0)
    e = _forward_tile(h_ref, z_ref, es_ref, wh_ref, wz_ref, w_res_ref,
                      b_res_ref, wp_ref, bp_ref, n_res=n_res)
    e_ref[...] = e

    if has_pad:
        ridx = t * row_tile + jax.lax.broadcasted_iota(jnp.int32, e.shape, 0)
        e_valid = jnp.where(ridx < n_rows, e, 0.0)
    else:
        e_valid = e
    s1 = jnp.sum(e_valid, axis=0, keepdims=True)
    s2 = jnp.sum(e_valid * e_valid, axis=0, keepdims=True)
    fill = jnp.zeros((6, e.shape[1]), jnp.float32)
    stats_ref[...] = jnp.concatenate([s1, s2, fill], axis=0
                                     ).reshape(1, 8, e.shape[1])


# ---------------------------------------------------------------------------
# Fallback pass 2: y = e * scale + shift  (2 SMEM scalars, lane-dense blocks).
# ---------------------------------------------------------------------------
def _affine_kernel(sc_ref, e_ref, o_ref):
    o_ref[...] = e_ref[...] * sc_ref[0] + sc_ref[1]


# ---------------------------------------------------------------------------
# Wrapper (jitted).
# ---------------------------------------------------------------------------
def _inference_forward(h, z, s, params, *, batch_size, sample_size, z_dim,
                       n_res, compute_dtype=jnp.bfloat16, row_tile=None):
    f32 = jnp.float32
    enc = params["wh"].shape[0]
    zin = params["wz"].shape[0]
    hidden = params["wh"].shape[1]
    out_dim = params["wp"].shape[1]            # 2 * z_dim (shared_var=False)
    n_rows = batch_size * sample_size

    # --- operand prep: no concat, no one-hot; s-projection hoisted ----------
    h2 = h.reshape(n_rows, enc).astype(compute_dtype)
    z2 = z.reshape(n_rows, zin).astype(compute_dtype)
    # es = s @ Ws + (bh + bz + bs): tiny (B, hidden) f32 matmul + cheap row
    # broadcast.  Keeps the bias add in f32 after the MXU accumulation and
    # keeps the in-kernel bf16 dots at K=enc / K=z_dim (16-aligned).
    es = jnp.dot(s.astype(f32), params["ws"].astype(f32))
    es = es + (params["bh"] + params["bz"] + params["bs"]).astype(f32)
    es_rep = jnp.broadcast_to(
        es[:, None, :], (batch_size, sample_size, hidden)
    ).reshape(n_rows, hidden)

    wh = params["wh"].astype(compute_dtype)
    wz = params["wz"].astype(compute_dtype)
    w_res = jnp.concatenate([params["w1"], params["w2"]], axis=0
                            ).astype(compute_dtype)
    b_res = jnp.concatenate([params["b1"], params["b2"]], axis=0).astype(f32)
    wp = params["wp"].astype(compute_dtype)
    bp = params["bp"].astype(f32)
    bn = params["bn"].astype(f32)

    # --- row tiling: large tiles, pad rows when they don't divide -----------
    n_rows_8 = _round_up(n_rows, 8)
    if row_tile is None:
        target = 2048
        num_tiles = max(1, _cdiv(n_rows_8, target))
        row_tile = _round_up(_cdiv(n_rows_8, num_tiles), 8)
    else:
        row_tile = _round_up(row_tile, 8)
    num_tiles = _cdiv(n_rows_8, row_tile)
    n_rows_p = num_tiles * row_tile
    has_pad = n_rows_p != n_rows
    if has_pad:
        pad = n_rows_p - n_rows
        h2 = jnp.pad(h2, ((0, pad), (0, 0)))
        z2 = jnp.pad(z2, ((0, pad), (0, 0)))
        es_rep = jnp.pad(es_rep, ((0, pad), (0, 0)))

    row_map = lambda t: (t, 0)
    full2 = lambda t: (0, 0)
    full3 = lambda t: (0, 0, 0)

    data_specs = [
        pl.BlockSpec((row_tile, enc), row_map),        # h
        pl.BlockSpec((row_tile, zin), row_map),        # z
        pl.BlockSpec((row_tile, hidden), row_map),     # es (+ fused biases)
        pl.BlockSpec((enc, hidden), full2),            # wh   (resident)
        pl.BlockSpec((zin, hidden), full2),            # wz   (resident)
        pl.BlockSpec((2 * n_res, hidden, hidden), full3),  # stacked res W
        pl.BlockSpec((2 * n_res, 1, hidden), full3),       # stacked res b
        pl.BlockSpec((hidden, out_dim), full2),        # wp
        pl.BlockSpec((1, out_dim), full2),             # bp
    ]
    data_args = (h2, z2, es_rep, wh, wz, w_res, b_res, wp, bp)

    # Fused path whenever the full pre-BN activation fits comfortably in VMEM.
    fused = n_rows_p * out_dim * 4 <= 4 * 1024 * 1024

    if fused:
        out_p = pl.pallas_call(
            functools.partial(_fused_kernel, n_res=n_res, n_rows=n_rows,
                              row_tile=row_tile, out_dim=out_dim,
                              has_pad=has_pad, single_tile=(num_tiles == 1)),
            grid=(num_tiles,),
            in_specs=[pl.BlockSpec(memory_space=pltpu.MemorySpace.SMEM)]
                     + data_specs,
            out_specs=pl.BlockSpec((n_rows_p, out_dim), full2),
            out_shape=jax.ShapeDtypeStruct((n_rows_p, out_dim), f32),
            scratch_shapes=[pltpu.VMEM((1, out_dim), f32),
                            pltpu.VMEM((1, out_dim), f32)],
            compiler_params=pltpu.CompilerParams(
                dimension_semantics=("arbitrary",),
                vmem_limit_bytes=32 * 1024 * 1024),
        )(bn, *data_args)
    else:
        # Two-pass fallback for very large row counts.
        e_pre, stats = pl.pallas_call(
            functools.partial(_fwd_tile_kernel, n_res=n_res, n_rows=n_rows,
                              row_tile=row_tile, has_pad=has_pad),
            grid=(num_tiles,),
            in_specs=data_specs,
            out_specs=(pl.BlockSpec((row_tile, out_dim), row_map),
                       pl.BlockSpec((1, 8, out_dim), lambda t: (t, 0, 0))),
            out_shape=(jax.ShapeDtypeStruct((n_rows_p, out_dim), f32),
                       jax.ShapeDtypeStruct((num_tiles, 8, out_dim), f32)),
            compiler_params=pltpu.CompilerParams(
                dimension_semantics=("parallel",),
                vmem_limit_bytes=32 * 1024 * 1024),
        )(*data_args)

        n_el = n_rows * out_dim
        total = jnp.sum(stats[:, 0, :])
        total_sq = jnp.sum(stats[:, 1, :])
        mean = total / n_el
        var = jnp.maximum(total_sq / n_el - mean * mean, 0.0)
        rstd = jax.lax.rsqrt(var + 1e-3)
        scale = bn[0] * rstd
        shift = bn[1] - mean * scale
        sc = jnp.stack([scale, shift])

        # Lane-dense view for the pure-elementwise pass when out_dim < 128.
        lane_rows = (row_tile * out_dim) // 128
        lane_dense = ((row_tile * out_dim) % 128 == 0
                      and (lane_rows % 8 == 0 or num_tiles == 1))
        if lane_dense:
            e_view = e_pre.reshape(num_tiles * lane_rows, 128)
            blk = (lane_rows, 128)
        else:
            e_view = e_pre
            blk = (row_tile, out_dim)

        out_p = pl.pallas_call(
            _affine_kernel,
            grid=(num_tiles,),
            in_specs=[pl.BlockSpec(memory_space=pltpu.MemorySpace.SMEM),
                      pl.BlockSpec(blk, row_map)],
            out_specs=pl.BlockSpec(blk, row_map),
            out_shape=jax.ShapeDtypeStruct(e_view.shape, f32),
            input_output_aliases={1: 0},
            compiler_params=pltpu.CompilerParams(
                dimension_semantics=("parallel",)),
        )(sc, e_view)
        out_p = out_p.reshape(n_rows_p, out_dim)

    out = out_p[:n_rows] if has_pad else out_p
    return out[:, :z_dim], out[:, z_dim:]


inference_network_pallas = jax.jit(
    _inference_forward,
    static_argnames=("batch_size", "sample_size", "z_dim", "n_res",
                     "compute_dtype", "row_tile"))


# ---------------------------------------------------------------------------
# Pure-JAX reference (module semantics; optional bf16 operand quantization
# matching the kernel's quantization choices for checking the fast path).
# ---------------------------------------------------------------------------
def inference_network_ref(h, z, s, params, *, sample_size, z_dim,
                          dot_dtype=jnp.float32):
    f32 = jnp.float32

    def dot(a, w):
        return jnp.dot(a.astype(dot_dtype), w.astype(dot_dtype),
                       preferred_element_type=f32)

    enc = params["wh"].shape[0]
    zin = params["wz"].shape[0]
    eh = dot(h.reshape(-1, enc), params["wh"]) + params["bh"]
    ez = dot(z.reshape(-1, zin), params["wz"]) + params["bz"]
    # The Pallas path hoists the tiny s-projection to f32; mirror that here so
    # the quantized comparison uses identical dot inputs.
    es = jnp.dot(s.astype(f32), params["ws"].astype(f32)) + params["bs"]
    es = jnp.repeat(es, sample_size, axis=0)
    e = _elu(eh + ez + es)

    def res_block(e, w, b):
        x = e
        n = w.shape[0]
        for i in range(n):
            e = dot(e, w[i]) + b[i, 0]
            if i < n - 1:
                e = _elu(e)
        return _elu(e + x)

    e = res_block(e, params["w1"], params["b1"])
    e = res_block(e, params["w2"], params["b2"])
    e = dot(e, params["wp"]) + params["bp"]
    m = e.mean()
    v = ((e - m) ** 2).mean()
    e = params["bn"][0] * (e - m) / jnp.sqrt(v + 1e-3) + params["bn"][1]
    return e[:, :z_dim], e[:, z_dim:]


# ---------------------------------------------------------------------------
# Main
# ---------------------------------------------------------------------------
if __name__ == "__main__":
    batch_size = 2
    sample_size = 8
    encoder_dim = 32
    hidden_dim = 32
    o_dim = 8
    z_dim = 16
    n_hidden = 3
    n_res = n_hidden - 1          # FCResBlock depth

    key = jax.random.PRNGKey(0)
    keys = jax.random.split(key, 20)

    def init(k, shape, scale=0.1):
        return (scale * jax.random.normal(k, shape)).astype(jnp.float32)

    params = {
        "wh": init(keys[0], (encoder_dim, hidden_dim)),
        "bh": init(keys[1], (1, hidden_dim)),
        "wz": init(keys[2], (z_dim, hidden_dim)),
        "bz": init(keys[3], (1, hidden_dim)),
        "ws": init(keys[4], (o_dim, hidden_dim)),
        "bs": init(keys[5], (1, hidden_dim)),
        "w1": init(keys[6], (n_res, hidden_dim, hidden_dim)),
        "b1": init(keys[7], (n_res, 1, hidden_dim)),
        "w2": init(keys[8], (n_res, hidden_dim, hidden_dim)),
        "b2": init(keys[9], (n_res, 1, hidden_dim)),
        "wp": init(keys[10], (hidden_dim, 2 * z_dim)),
        "bp": init(keys[11], (1, 2 * z_dim)),
        # BatchNorm1d(1) affine params [gamma, beta] (default init: 1, 0)
        "bn": jnp.array([1.0, 0.0], jnp.float32),
    }

    h = jax.random.normal(keys[12], (batch_size, sample_size, encoder_dim),
                          jnp.float32)
    z = jax.random.normal(keys[13], (batch_size, sample_size, z_dim),
                          jnp.float32)
    s = jax.random.normal(keys[14], (batch_size, o_dim), jnp.float32)

    common = dict(batch_size=batch_size, sample_size=sample_size,
                  z_dim=z_dim, n_res=n_res)

    # Exact f32 path: matches the PyTorch module semantics.
    m32, lv32 = inference_network_pallas(h, z, s, params,
                                         compute_dtype=jnp.float32, **common)
    jax.block_until_ready((m32, lv32))
    mref, lvref = inference_network_ref(h, z, s, params,
                                        sample_size=sample_size, z_dim=z_dim,
                                        dot_dtype=jnp.float32)
    np.testing.assert_allclose(np.asarray(m32), np.asarray(mref),
                               rtol=2e-3, atol=2e-3)
    np.testing.assert_allclose(np.asarray(lv32), np.asarray(lvref),
                               rtol=2e-3, atol=2e-3)

    # bf16-operand fast path (all chips: MXU is natively bf16; f32 accumulation
    # and f32 ELU/bias/BN), checked against a reference with identical bf16
    # operand quantization.
    mbf, lvbf = inference_network_pallas(h, z, s, params,
                                         compute_dtype=jnp.bfloat16, **common)
    jax.block_until_ready((mbf, lvbf))
    mrefb, lvrefb = inference_network_ref(h, z, s, params,
                                          sample_size=sample_size, z_dim=z_dim,
                                          dot_dtype=jnp.bfloat16)
    np.testing.assert_allclose(np.asarray(mbf), np.asarray(mrefb),
                               rtol=1e-2, atol=1e-2)
    np.testing.assert_allclose(np.asarray(lvbf), np.asarray(lvrefb),
                               rtol=1e-2, atol=1e-2)

    print("KERNEL_OK")
</pallas_src>

<mosaic_0001>
module attributes {stable_mosaic.version = 11 : i64} {
  func.func @_fused_kernel(%arg0: i32, %arg1: memref<2xf32, #tpu.memory_space<smem>>, %arg2: memref<16x32xf32, #tpu.memory_space<vmem>>, %arg3: memref<16x16xf32, #tpu.memory_space<vmem>>, %arg4: memref<16x32xf32, #tpu.memory_space<vmem>>, %arg5: memref<32x32xf32, #tpu.memory_space<vmem>>, %arg6: memref<16x32xf32, #tpu.memory_space<vmem>>, %arg7: memref<4x32x32xf32, #tpu.memory_space<vmem>>, %arg8: memref<4x1x32xf32, #tpu.memory_space<vmem>>, %arg9: memref<32x32xf32, #tpu.memory_space<vmem>>, %arg10: memref<1x32xf32, #tpu.memory_space<vmem>>, %arg11: memref<16x32xf32, #tpu.memory_space<vmem>>, %arg12: memref<1x32xf32, #tpu.memory_space<vmem>>, %arg13: memref<1x32xf32, #tpu.memory_space<vmem>>) attributes {dimension_semantics = [#tpu.dimension_semantics<arbitrary>], iteration_bounds = array<i64: 1>, scalar_prefetch = 0 : i64, scratch_operands = 2 : i64, tpu.core_type = #tpu.core_type<tc>, window_params = [{transform_indices = @transform_0, window_bounds = array<i64: 2>}, {transform_indices = @transform_1, window_bounds = array<i64: 16, 32>}, {transform_indices = @transform_2, window_bounds = array<i64: 16, 16>}, {transform_indices = @transform_3, window_bounds = array<i64: 16, 32>}, {pipeline_mode = #tpu.pipeline_mode<synchronous>, transform_indices = @transform_4, window_bounds = array<i64: 32, 32>}, {pipeline_mode = #tpu.pipeline_mode<synchronous>, transform_indices = @transform_5, window_bounds = array<i64: 16, 32>}, {pipeline_mode = #tpu.pipeline_mode<synchronous>, transform_indices = @transform_6, window_bounds = array<i64: 4, 32, 32>}, {pipeline_mode = #tpu.pipeline_mode<synchronous>, transform_indices = @transform_7, window_bounds = array<i64: 4, 1, 32>}, {pipeline_mode = #tpu.pipeline_mode<synchronous>, transform_indices = @transform_8, window_bounds = array<i64: 32, 32>}, {pipeline_mode = #tpu.pipeline_mode<synchronous>, transform_indices = @transform_9, window_bounds = array<i64: 1, 32>}, {pipeline_mode = #tpu.pipeline_mode<synchronous>, transform_indices = @transform_10, window_bounds = array<i64: 16, 32>}]} {
    %c0 = arith.constant 0 : index
    %c0_0 = arith.constant 0 : index
    %0 = vector.load %arg2[%c0, %c0_0] : memref<16x32xf32, #tpu.memory_space<vmem>>, vector<16x32xf32>
    %c0_1 = arith.constant 0 : index
    %c0_2 = arith.constant 0 : index
    %1 = vector.load %arg5[%c0_1, %c0_2] : memref<32x32xf32, #tpu.memory_space<vmem>>, vector<32x32xf32>
    %cst = arith.constant dense<0.000000e+00> : vector<16x32xf32>
    %2 = tpu.matmul %0, %1, %cst {dimension_numbers = #tpu.dot_dimension_numbers<[1], [0], [0], [1], [0, 0, 1, 1], [], []>} : vector<16x32xf32>, vector<32x32xf32>, vector<16x32xf32> -> vector<16x32xf32>
    %c0_3 = arith.constant 0 : index
    %c0_4 = arith.constant 0 : index
    %3 = vector.load %arg3[%c0_3, %c0_4] : memref<16x16xf32, #tpu.memory_space<vmem>>, vector<16x16xf32>
    %c0_5 = arith.constant 0 : index
    %c0_6 = arith.constant 0 : index
    %4 = vector.load %arg6[%c0_5, %c0_6] : memref<16x32xf32, #tpu.memory_space<vmem>>, vector<16x32xf32>
    %cst_7 = arith.constant dense<0.000000e+00> : vector<16x32xf32>
    %5 = tpu.matmul %3, %4, %cst_7 {dimension_numbers = #tpu.dot_dimension_numbers<[1], [0], [0], [1], [0, 0, 1, 1], [], []>} : vector<16x16xf32>, vector<16x32xf32>, vector<16x32xf32> -> vector<16x32xf32>
    %6 = arith.addf %2, %5 : vector<16x32xf32>
    %c0_8 = arith.constant 0 : index
    %c0_9 = arith.constant 0 : index
    %7 = vector.load %arg4[%c0_8, %c0_9] : memref<16x32xf32, #tpu.memory_space<vmem>>, vector<16x32xf32>
    %8 = arith.addf %6, %7 : vector<16x32xf32>
    %cst_10 = arith.constant 0.000000e+00 : f32
    %9 = vector.broadcast %cst_10 : f32 to vector<16x32xf32>
    %10 = arith.cmpf ogt, %8, %9 : vector<16x32xf32>
    %cst_11 = arith.constant 0.000000e+00 : f32
    %11 = vector.broadcast %cst_11 : f32 to vector<16x32xf32>
    %12 = arith.minimumf %8, %11 : vector<16x32xf32>
    %13 = math.exp %12 : vector<16x32xf32>
    %cst_12 = arith.constant 1.000000e+00 : f32
    %14 = vector.broadcast %cst_12 : f32 to vector<16x32xf32>
    %15 = arith.subf %13, %14 : vector<16x32xf32>
    %16 = arith.select %10, %8, %15 : vector<16x32xi1>, vector<16x32xf32>
    %c0_13 = arith.constant 0 : index
    %c0_14 = arith.constant 0 : index
    %c0_15 = arith.constant 0 : index
    %17 = vector.load %arg7[%c0_13, %c0_14, %c0_15] : memref<4x32x32xf32, #tpu.memory_space<vmem>>, vector<1x32x32xf32>
    %18 = vector.shape_cast %17 : vector<1x32x32xf32> to vector<32x32xf32>
    %cst_16 = arith.constant dense<0.000000e+00> : vector<16x32xf32>
    %19 = tpu.matmul %16, %18, %cst_16 {dimension_numbers = #tpu.dot_dimension_numbers<[1], [0], [0], [1], [0, 0, 1, 1], [], []>} : vector<16x32xf32>, vector<32x32xf32>, vector<16x32xf32> -> vector<16x32xf32>
    %c0_17 = arith.constant 0 : index
    %c0_18 = arith.constant 0 : index
    %c0_19 = arith.constant 0 : index
    %20 = vector.load %arg8[%c0_17, %c0_18, %c0_19] : memref<4x1x32xf32, #tpu.memory_space<vmem>>, vector<1x1x32xf32>
    %21 = vector.shape_cast %20 : vector<1x1x32xf32> to vector<1x32xf32>
    %22 = vector.broadcast %21 : vector<1x32xf32> to vector<16x32xf32>
    %23 = arith.addf %19, %22 : vector<16x32xf32>
    %cst_20 = arith.constant 0.000000e+00 : f32
    %24 = vector.broadcast %cst_20 : f32 to vector<16x32xf32>
    %25 = arith.cmpf ogt, %23, %24 : vector<16x32xf32>
    %cst_21 = arith.constant 0.000000e+00 : f32
    %26 = vector.broadcast %cst_21 : f32 to vector<16x32xf32>
    %27 = arith.minimumf %23, %26 : vector<16x32xf32>
    %28 = math.exp %27 : vector<16x32xf32>
    %cst_22 = arith.constant 1.000000e+00 : f32
    %29 = vector.broadcast %cst_22 : f32 to vector<16x32xf32>
    %30 = arith.subf %28, %29 : vector<16x32xf32>
    %31 = arith.select %25, %23, %30 : vector<16x32xi1>, vector<16x32xf32>
    %c1 = arith.constant 1 : index
    %c0_23 = arith.constant 0 : index
    %c0_24 = arith.constant 0 : index
    %32 = vector.load %arg7[%c1, %c0_23, %c0_24] : memref<4x32x32xf32, #tpu.memory_space<vmem>>, vector<1x32x32xf32>
    %33 = vector.shape_cast %32 : vector<1x32x32xf32> to vector<32x32xf32>
    %cst_25 = arith.constant dense<0.000000e+00> : vector<16x32xf32>
    %34 = tpu.matmul %31, %33, %cst_25 {dimension_numbers = #tpu.dot_dimension_numbers<[1], [0], [0], [1], [0, 0, 1, 1], [], []>} : vector<16x32xf32>, vector<32x32xf32>, vector<16x32xf32> -> vector<16x32xf32>
    %c1_26 = arith.constant 1 : index
    %c0_27 = arith.constant 0 : index
    %c0_28 = arith.constant 0 : index
    %35 = vector.load %arg8[%c1_26, %c0_27, %c0_28] : memref<4x1x32xf32, #tpu.memory_space<vmem>>, vector<1x1x32xf32>
    %36 = vector.shape_cast %35 : vector<1x1x32xf32> to vector<1x32xf32>
    %37 = vector.broadcast %36 : vector<1x32xf32> to vector<16x32xf32>
    %38 = arith.addf %34, %37 : vector<16x32xf32>
    %39 = arith.addf %38, %16 : vector<16x32xf32>
    %cst_29 = arith.constant 0.000000e+00 : f32
    %40 = vector.broadcast %cst_29 : f32 to vector<16x32xf32>
    %41 = arith.cmpf ogt, %39, %40 : vector<16x32xf32>
    %cst_30 = arith.constant 0.000000e+00 : f32
    %42 = vector.broadcast %cst_30 : f32 to vector<16x32xf32>
    %43 = arith.minimumf %39, %42 : vector<16x32xf32>
    %44 = math.exp %43 : vector<16x32xf32>
    %cst_31 = arith.constant 1.000000e+00 : f32
    %45 = vector.broadcast %cst_31 : f32 to vector<16x32xf32>
    %46 = arith.subf %44, %45 : vector<16x32xf32>
    %47 = arith.select %41, %39, %46 : vector<16x32xi1>, vector<16x32xf32>
    %c2 = arith.constant 2 : index
    %c0_32 = arith.constant 0 : index
    %c0_33 = arith.constant 0 : index
    %48 = vector.load %arg7[%c2, %c0_32, %c0_33] : memref<4x32x32xf32, #tpu.memory_space<vmem>>, vector<1x32x32xf32>
    %49 = vector.shape_cast %48 : vector<1x32x32xf32> to vector<32x32xf32>
    %cst_34 = arith.constant dense<0.000000e+00> : vector<16x32xf32>
    %50 = tpu.matmul %47, %49, %cst_34 {dimension_numbers = #tpu.dot_dimension_numbers<[1], [0], [0], [1], [0, 0, 1, 1], [], []>} : vector<16x32xf32>, vector<32x32xf32>, vector<16x32xf32> -> vector<16x32xf32>
    %c2_35 = arith.constant 2 : index
    %c0_36 = arith.constant 0 : index
    %c0_37 = arith.constant 0 : index
    %51 = vector.load %arg8[%c2_35, %c0_36, %c0_37] : memref<4x1x32xf32, #tpu.memory_space<vmem>>, vector<1x1x32xf32>
    %52 = vector.shape_cast %51 : vector<1x1x32xf32> to vector<1x32xf32>
    %53 = vector.broadcast %52 : vector<1x32xf32> to vector<16x32xf32>
    %54 = arith.addf %50, %53 : vector<16x32xf32>
    %cst_38 = arith.constant 0.000000e+00 : f32
    %55 = vector.broadcast %cst_38 : f32 to vector<16x32xf32>
    %56 = arith.cmpf ogt, %54, %55 : vector<16x32xf32>
    %cst_39 = arith.constant 0.000000e+00 : f32
    %57 = vector.broadcast %cst_39 : f32 to vector<16x32xf32>
    %58 = arith.minimumf %54, %57 : vector<16x32xf32>
    %59 = math.exp %58 : vector<16x32xf32>
    %cst_40 = arith.constant 1.000000e+00 : f32
    %60 = vector.broadcast %cst_40 : f32 to vector<16x32xf32>
    %61 = arith.subf %59, %60 : vector<16x32xf32>
    %62 = arith.select %56, %54, %61 : vector<16x32xi1>, vector<16x32xf32>
    %c3 = arith.constant 3 : index
    %c0_41 = arith.constant 0 : index
    %c0_42 = arith.constant 0 : index
    %63 = vector.load %arg7[%c3, %c0_41, %c0_42] : memref<4x32x32xf32, #tpu.memory_space<vmem>>, vector<1x32x32xf32>
    %64 = vector.shape_cast %63 : vector<1x32x32xf32> to vector<32x32xf32>
    %cst_43 = arith.constant dense<0.000000e+00> : vector<16x32xf32>
    %65 = tpu.matmul %62, %64, %cst_43 {dimension_numbers = #tpu.dot_dimension_numbers<[1], [0], [0], [1], [0, 0, 1, 1], [], []>} : vector<16x32xf32>, vector<32x32xf32>, vector<16x32xf32> -> vector<16x32xf32>
    %c3_44 = arith.constant 3 : index
    %c0_45 = arith.constant 0 : index
    %c0_46 = arith.constant 0 : index
    %66 = vector.load %arg8[%c3_44, %c0_45, %c0_46] : memref<4x1x32xf32, #tpu.memory_space<vmem>>, vector<1x1x32xf32>
    %67 = vector.shape_cast %66 : vector<1x1x32xf32> to vector<1x32xf32>
    %68 = vector.broadcast %67 : vector<1x32xf32> to vector<16x32xf32>
    %69 = arith.addf %65, %68 : vector<16x32xf32>
    %70 = arith.addf %69, %47 : vector<16x32xf32>
    %cst_47 = arith.constant 0.000000e+00 : f32
    %71 = vector.broadcast %cst_47 : f32 to vector<16x32xf32>
    %72 = arith.cmpf ogt, %70, %71 : vector<16x32xf32>
    %cst_48 = arith.constant 0.000000e+00 : f32
    %73 = vector.broadcast %cst_48 : f32 to vector<16x32xf32>
    %74 = arith.minimumf %70, %73 : vector<16x32xf32>
    %75 = math.exp %74 : vector<16x32xf32>
    %cst_49 = arith.constant 1.000000e+00 : f32
    %76 = vector.broadcast %cst_49 : f32 to vector<16x32xf32>
    %77 = arith.subf %75, %76 : vector<16x32xf32>
    %78 = arith.select %72, %70, %77 : vector<16x32xi1>, vector<16x32xf32>
    %c0_50 = arith.constant 0 : index
    %c0_51 = arith.constant 0 : index
    %79 = vector.load %arg9[%c0_50, %c0_51] : memref<32x32xf32, #tpu.memory_space<vmem>>, vector<32x32xf32>
    %cst_52 = arith.constant dense<0.000000e+00> : vector<16x32xf32>
    %80 = tpu.matmul %78, %79, %cst_52 {dimension_numbers = #tpu.dot_dimension_numbers<[1], [0], [0], [1], [0, 0, 1, 1], [], []>} : vector<16x32xf32>, vector<32x32xf32>, vector<16x32xf32> -> vector<16x32xf32>
    %c0_53 = arith.constant 0 : index
    %c0_54 = arith.constant 0 : index
    %81 = vector.load %arg10[%c0_53, %c0_54] : memref<1x32xf32, #tpu.memory_space<vmem>>, vector<1x32xf32>
    %82 = vector.broadcast %81 : vector<1x32xf32> to vector<16x32xf32>
    %83 = arith.addf %80, %82 : vector<16x32xf32>
    %c0_55 = arith.constant 0 : index
    %84 = memref.load %arg1[%c0_55] : memref<2xf32, #tpu.memory_space<smem>>
    %c1_56 = arith.constant 1 : index
    %85 = memref.load %arg1[%c1_56] : memref<2xf32, #tpu.memory_space<smem>>
    %86 = vector.shape_cast %83 : vector<16x32xf32> to vector<1x16x32xf32>
    %cst_57 = arith.constant dense<0.000000e+00> : vector<1xf32>
    %87 = vector.multi_reduction <add>, %86, %cst_57 [1, 2] : vector<1x16x32xf32> to vector<1xf32>
    %88 = vector.shape_cast %87 : vector<1xf32> to vector<1x1x1xf32>
    %89 = vector.extract %88[0, 0, 0] : f32 from vector<1x1x1xf32>
    %90 = arith.mulf %83, %83 : vector<16x32xf32>
    %91 = vector.shape_cast %90 : vector<16x32xf32> to vector<1x16x32xf32>
    %cst_58 = arith.constant dense<0.000000e+00> : vector<1xf32>
    %92 = vector.multi_reduction <add>, %91, %cst_58 [1, 2] : vector<1x16x32xf32> to vector<1xf32>
    %93 = vector.shape_cast %92 : vector<1xf32> to vector<1x1x1xf32>
    %94 = vector.extract %93[0, 0, 0] : f32 from vector<1x1x1xf32>
    %cst_59 = arith.constant 5.120000e+02 : f32
    %95 = arith.divf %89, %cst_59 : f32
    %cst_60 = arith.constant 5.120000e+02 : f32
    %96 = arith.divf %94, %cst_60 : f32
    %97 = arith.mulf %95, %95 : f32
    %98 = arith.subf %96, %97 : f32
    %cst_61 = arith.constant 0.000000e+00 : f32
    %99 = arith.maximumf %98, %cst_61 : f32
    %cst_62 = arith.constant 1.000000e-03 : f32
    %100 = arith.addf %99, %cst_62 : f32
    %101 = math.rsqrt %100 : f32
    %102 = arith.mulf %84, %101 : f32
    %103 = arith.mulf %95, %102 : f32
    %104 = arith.subf %85, %103 : f32
    %105 = vector.broadcast %102 : f32 to vector<16x32xf32>
    %106 = arith.mulf %83, %105 : vector<16x32xf32>
    %107 = vector.broadcast %104 : f32 to vector<16x32xf32>
    %108 = arith.addf %106, %107 : vector<16x32xf32>
    %c0_63 = arith.constant 0 : index
    %c0_64 = arith.constant 0 : index
    %109 = vector.load %arg11[%c0_63, %c0_64] : memref<16x32xf32, #tpu.memory_space<vmem>>, vector<16x32xf32>
    tpu.vector_store %arg11[%c0_63, %c0_64], %108 {strides = array<i32>} : memref<16x32xf32, #tpu.memory_space<vmem>>, vector<16x32xf32>,
    return
  }
  func.func @transform_0(%arg0: i32) -> i32 {
    %c0_i32 = arith.constant 0 : i32
    %c0_i32_0 = arith.constant 0 : i32
    return %c0_i32 : i32
  }
  func.func @transform_1(%arg0: i32) -> (i32, i32) {
    %c0_i32 = arith.constant 0 : i32
    %c0_i32_0 = arith.constant 0 : i32
    return %arg0, %c0_i32 : i32, i32
  }
  func.func @transform_2(%arg0: i32) -> (i32, i32) {
    %c0_i32 = arith.constant 0 : i32
    %c0_i32_0 = arith.constant 0 : i32
    return %arg0, %c0_i32 : i32, i32
  }
  func.func @transform_3(%arg0: i32) -> (i32, i32) {
    %c0_i32 = arith.constant 0 : i32
    %c0_i32_0 = arith.constant 0 : i32
    return %arg0, %c0_i32 : i32, i32
  }
  func.func @transform_4(%arg0: i32) -> (i32, i32) {
    %c0_i32 = arith.constant 0 : i32
    %c0_i32_0 = arith.constant 0 : i32
    %c0_i32_1 = arith.constant 0 : i32
    return %c0_i32, %c0_i32_0 : i32, i32
  }
  func.func @transform_5(%arg0: i32) -> (i32, i32) {
    %c0_i32 = arith.constant 0 : i32
    %c0_i32_0 = arith.constant 0 : i32
    %c0_i32_1 = arith.constant 0 : i32
    return %c0_i32, %c0_i32_0 : i32, i32
  }
  func.func @transform_6(%arg0: i32) -> (i32, i32, i32) {
    %c0_i32 = arith.constant 0 : i32
    %c0_i32_0 = arith.constant 0 : i32
    %c0_i32_1 = arith.constant 0 : i32
    %c0_i32_2 = arith.constant 0 : i32
    return %c0_i32, %c0_i32_0, %c0_i32_1 : i32, i32, i32
  }
  func.func @transform_7(%arg0: i32) -> (i32, i32, i32) {
    %c0_i32 = arith.constant 0 : i32
    %c0_i32_0 = arith.constant 0 : i32
    %c0_i32_1 = arith.constant 0 : i32
    %c0_i32_2 = arith.constant 0 : i32
    return %c0_i32, %c0_i32_0, %c0_i32_1 : i32, i32, i32
  }
  func.func @transform_8(%arg0: i32) -> (i32, i32) {
    %c0_i32 = arith.constant 0 : i32
    %c0_i32_0 = arith.constant 0 : i32
    %c0_i32_1 = arith.constant 0 : i32
    return %c0_i32, %c0_i32_0 : i32, i32
  }
  func.func @transform_9(%arg0: i32) -> (i32, i32) {
    %c0_i32 = arith.constant 0 : i32
    %c0_i32_0 = arith.constant 0 : i32
    %c0_i32_1 = arith.constant 0 : i32
    return %c0_i32, %c0_i32_0 : i32, i32
  }
  func.func @transform_10(%arg0: i32) -> (i32, i32) {
    %c0_i32 = arith.constant 0 : i32
    %c0_i32_0 = arith.constant 0 : i32
    %c0_i32_1 = arith.constant 0 : i32
    return %c0_i32, %c0_i32_0 : i32, i32
  }
}

</mosaic_0001>

<bundles_post_ra>
// kernel: _inference_forward.1
= control target key start
LH: loop header
LB: loop body
LE: loop exit
PB: predicated region body
PF: predicated region fallthrough
CT: control target
= control target key end

     0   :  { %15 = vsyncpa [#allocation5], 0  ;;  %s1264_s0 = inlined_call_operand.vmem [shape: f32[2], index: 0, kind: input, shape index: {}]   ;;  %s1265_s1 = inlined_call_operand.vmem [shape: f32[16,32], index: 1, kind: input, shape index: {}]   ;;  %s1266_s2 = inlined_call_operand.vmem [shape: f32[16,16], index: 2, kind: input, shape index: {}]   ;;  %s1267_s3 = inlined_call_operand.vmem [shape: f32[16,32], index: 3, kind: input, shape index: {}]   ;;  %s1268_s4 = inlined_call_operand.vmem [shape: f32[32,32], index: 4, kind: input, shape index: {}]   ;;  %s1269_s5 = inlined_call_operand.vmem [shape: f32[16,32], index: 5, kind: input, shape index: {}]   ;;  %s1270_s6 = inlined_call_operand.vmem [shape: f32[4,32,32], index: 6, kind: input, shape index: {}]   ;;  %s1271_s7 = inlined_call_operand.vmem [shape: f32[4,1,32], index: 7, kind: input, shape index: {}]   ;;  %s1272_s8 = inlined_call_operand.vmem [shape: f32[32,32], index: 8, kind: input, shape index: {}]   ;;  %s1273_s9 = inlined_call_operand.vmem [shape: f32[1,32], index: 9, kind: input, shape index: {}]   ;;  %s1274_s10 = inlined_call_operand.vmem [shape: f32[16,32], index: 10, kind: output, shape index: {}]  }
   0x1   :  { %s22_s15 = sshll.u32 %s1264_s0, 4  ;;  %s23_s15 = int_to_ptr.vmem [resolvable:$true] %s22_s15 }
   0x2   :  { %s1055_s16 = scalar_lea.vmem %s23_s15, 16  ;;  %p1060_p1 = scmp.lt.s32.totalorder %s23_s15, %s23_s15 }
   0x3   :  { %p1056_p0 = scmp.ne.s32.totalorder %s23_s15, %s1055_s16  ;;  %p1061_p2 = scmp.lt.s32.totalorder %s1055_s16, %s1055_s16 }
   0x5   :  { %p1062_p3 = por %p1061_p2, %p1060_p1 }
   0x7   :  { %p1063_p4 = pnand %p1062_p3, %p1056_p0 }
   0x9   :  { %1066 = shalt.err (!%p1063_p4)
}
   0xa   :  { %s1069_s17 = smov [#allocation4]  }
   0xb   :  { %25 = dma.vmem_to_smem %s23_s15, 16, %s1069_s17, [#allocation5]  }
   0xc   :  { %1067 = dma.done.wait [#allocation5], 16  }
   0xd   :  { %1068 = vsyncadd [#allocation5], 4294967280 }
   0xe   :  { %47 = sfence }
   0xf   :  { %v56_v0 = vld [vmem:[%s1269_s5] sm:$0xff]  ;;  %v57_v1 = vld [vmem:[%s1269_s5 + $0x8] sm:$0xff]  ;;  %vm58_vm0 = vcmask 130048   ;;  %v52_v7 = vld [vmem:[%s1268_s4 + $0x10] sm:$0xff]  ;;  %vm140_vm1 = vcmask 261120   ;;  %s1070_s18 = smov 0.0  }
  0x10   :  { %v54_v2 = vld [vmem:[%s1266_s2] sm:$0xff]  ;;  %v971_v3 = vpack.c.bf16 %v57_v1, %v56_v0  ;;  %v51_v5 = vld [vmem:[%s1268_s4 + $0x8] sm:$0xff]  ;;  %v53_v8 = vld [vmem:[%s1268_s4 + $0x18] sm:$0xff]  ;;  %s756_s21 = sld [smem:[#allocation4]] }
  0x11   :  { %902 = vmatprep.mubr.msk.f32.mxu0 %vm58_vm0, %v54_v2  ;;  %v50_v4 = vld [vmem:[%s1268_s4] sm:$0xff]  ;;  %v55_v9 = vld [vmem:[%s1266_s2 + $0x8] sm:$0xff]  ;;  %v979_v10 = vpack.c.bf16 %v53_v8, %v52_v7  ;;  %v240_v15 = vld [vmem:[%s1270_s6 + $0x10] sm:$0xff] }
  0x12   :  { %v975_v6 = vpack.c.bf16 %v51_v5, %v50_v4  ;;  %972 = vmatprep.subr.bf16.mxu0 %v971_v3  ;;  %v48_v11 = vld [vmem:[%s1265_s1] sm:$0xff]  ;;  %v49_v12 = vld [vmem:[%s1265_s1 + $0x8] sm:$0xff]  ;;  %v241_v17 = vld [vmem:[%s1270_s6 + $0x18] sm:$0xff]  ;;  %s857_s1 = sld [smem:[#allocation4 + $0x1]] }
  0x13   :  { %974 = vmatpush3.bf16.msra.mxu0 %v971_v3  ;;  %v238_v13 = vld [vmem:[%s1270_s6] sm:$0xff]  ;;  %v239_v14 = vld [vmem:[%s1270_s6 + $0x8] sm:$0xff]  ;;  %v987_v18 = vpack.c.bf16 %v241_v17, %v240_v15  ;;  %v826_v38 = vld [vmem:[%s1270_s6 + $0x30] sm:$0xff] }
  0x14   :  { %976 = vmatprep.subr.bf16.mxu0 %v975_v6  ;;  %v983_v16 = vpack.c.bf16 %v239_v14, %v238_v13  ;;  %v223_v19 = vld [vmem:[%s1267_s3 + $0x8] sm:$0xff]  ;;  %v222_v20 = vld [vmem:[%s1267_s3] sm:$0xff]  ;;  %v827_v39 = vld [vmem:[%s1270_s6 + $0x38] sm:$0xff] }
  0x15   :  { %v824_v35 = vld [vmem:[%s1270_s6 + $0x20] sm:$0xff]  ;;  %v825_v36 = vld [vmem:[%s1270_s6 + $0x28] sm:$0xff]  ;;  %v995_v40 = vpack.c.bf16 %v827_v39, %v826_v38  ;;  %v836_v58 = vld [vmem:[%s1270_s6 + $0x50] sm:$0xff] }
  0x16   :  { %903 = vmatmul.mubr.msk.f32.vlgmr.msra.gmra.mrb[0].mxu0 %vm58_vm0, %v55_v9  ;;  %984 = vmatprep.subr.bf16.mxu1 %v983_v16  ;;  %v991_v37 = vpack.c.bf16 %v825_v36, %v824_v35  ;;  %v819_v41 = vld [vmem:[%s1271_s7] ss:$0 sm:$0xff]  ;;  %v835_v57 = vld [vmem:[%s1270_s6 + $0x48] sm:$0xff]  ;;  %v837_v60 = vld [vmem:[%s1270_s6 + $0x58] sm:$0xff] }
  0x17   :  { %978 = vmatpush3.bf16.msra.mxu0 %v975_v6  ;;  %913 = vmatprep.mubr.msk.f32.mxu0 %vm140_vm1, %v48_v11  ;;  %v834_v56 = vld [vmem:[%s1270_s6 + $0x40] sm:$0xff]  ;;  %v1003_v61 = vpack.c.bf16 %v837_v60, %v836_v58  ;;  %v666_v38 = vld [vmem:[%s1272_s8 + $0x10] sm:$0xff] }
  0x18   :  { %980 = vmatprep.subr.bf16.mxu0 %v979_v10  ;;  %986 = vmatpush3.bf16.msra.mxu1 %v983_v16  ;;  %v999_v59 = vpack.c.bf16 %v835_v57, %v834_v56  ;;  %v829_v62 = vld [vmem:[%s1271_s7 + $0x1] ss:$0 sm:$0xff]  ;;  %v845_v16 = vld [vmem:[%s1270_s6 + $0x68] sm:$0xff] }
  0x19   :  { %988 = vmatprep.subr.bf16.mxu1 %v987_v18  ;;  %v844_v15 = vld [vmem:[%s1270_s6 + $0x60] sm:$0xff] }
  0x1a   :  { %v1007_v17 = vpack.c.bf16 %v845_v16, %v844_v15  ;;  %v664_v36 = vld [vmem:[%s1272_s8] sm:$0xff] }
  0x1b   :  { %982 = vmatpush3.bf16.msra.mxu0 %v979_v10 }
  0x1c   :  { %990 = vmatpush3.bf16.msra.mxu1 %v987_v18  ;;  %1000 = vmatprep.subr.bf16.mxu0 %v999_v59  ;;  %v846_v18 = vld [vmem:[%s1270_s6 + $0x70] sm:$0xff] }
  0x1d   :  { %992 = vmatprep.subr.bf16.mxu1 %v991_v37 }
  0x1e   :  { %914 = vmatmul.mubr.msk.f32.vlgmr.msra.gmra.mrb[0].mxu0 %vm140_vm1, %v49_v12 }
  0x1f   :  { %1002 = vmatpush3.bf16.msra.mxu0 %v999_v59  ;;  %v854_v59 = vld [vmem:[%s1273_s9] ss:$0 sm:$0xff] }
  0x20   :  { %1004 = vmatprep.subr.bf16.mxu0 %v1003_v61 }
  0x23   :  { %1006 = vmatpush3.bf16.msra.mxu0 %v1003_v61 }
  0xf1   :  { %v915_v21 = vpop.f32.mrb[0].mxu0 }
  0xf2   :  { %v225_v22 = vadd.f32 %v915_v21, %v223_v19  ;;  %v213_v23 = vpop.f32.mrb[1].mxu0  ;;  %v847_v19 = vld [vmem:[%s1270_s6 + $0x78] sm:$0xff]  ;;  %v839_v21 = vld [vmem:[%s1271_s7 + $0x2] ss:$0 sm:$0xff] }
  0xf3   :  { %v224_v24 = vadd.f32 %v222_v20, %v213_v23  ;;  %v1011_v20 = vpack.c.bf16 %v847_v19, %v846_v18 }
  0xf4   :  { %v229_v25 = vmin.f32 %v225_v22, 0.0  ;;  %vm227_vm3 = vcmp.gt.f32.partialorder %v225_v22, 0.0 }
  0xf5   :  { %v228_v26 = vmin.f32 %v224_v24, 0.0  ;;  %vm226_vm2 = vcmp.gt.f32.partialorder %v224_v24, 0.0 }
  0xf6   :  { %v232_v27 = vmul.f32 1.442695, %v229_v25 }
  0xf7   :  { %v230_v28 = vmul.f32 1.442695, %v228_v26 }
  0xf8   :  { %1033 = vpow2.f32 %v232_v27 }
  0xf9   :  { %1035 = vpow2.f32 %v230_v28 }
 0x102   :  { %v1034_v29 = vpop.eup %1033 }
 0x103   :  { %v1036_v30 = vpop.eup %1035  ;;  %v818_v31 = vadd.f32 -1.0, %v1034_v29 }
 0x104   :  { %v817_v32 = vadd.f32 -1.0, %v1036_v30 }
 0x105   :  { %v237_v34 = vsel %vm227_vm3, %v225_v22, %v818_v31 }
 0x106   :  { %v236_v33 = vsel %vm226_vm2, %v224_v24, %v817_v32 }
 0x107   :  { %924 = vmatprep.mubr.msk.f32.mxu1 %vm140_vm1, %v236_v33 }
 0x108   :  { %925 = vmatmul.mubr.msk.f32.vlgmr.msra.gmra.mrb[0].mxu1 %vm140_vm1, %v237_v34 }
 0x109   :  { %994 = vmatpush3.bf16.msra.mxu1 %v991_v37  ;;  %v665_v37 = vld [vmem:[%s1272_s8 + $0x8] sm:$0xff] }
 0x10a   :  { %996 = vmatprep.subr.bf16.mxu1 %v995_v40  ;;  %v1015_v39 = vpack.c.bf16 %v665_v37, %v664_v36 }
 0x10c   :  { %1016 = vmatprep.subr.bf16.mxu0 %v1015_v39 }
 0x10d   :  { %998 = vmatpush3.bf16.msra.mxu1 %v995_v40  ;;  %v667_v40 = vld [vmem:[%s1272_s8 + $0x18] sm:$0xff] }
 0x10e   :  { %1008 = vmatprep.subr.bf16.mxu1 %v1007_v17 }
 0x1db   :  { %v926_v42 = vpop.f32.mrb[0].mxu1 }
 0x1dc   :  { %v327_v43 = vadd.f32 %v926_v42, %v819_v41  ;;  %v321_v44 = vpop.f32.mrb[1].mxu1  ;;  %v849_v42 = vld [vmem:[%s1271_s7 + $0x3] ss:$0 sm:$0xff] }
 0x1dd   :  { %v322_v45 = vadd.f32 %v819_v41, %v321_v44  ;;  %v1019_v41 = vpack.c.bf16 %v667_v40, %v666_v38 }
 0x1de   :  { %v333_v46 = vmin.f32 %v327_v43, 0.0  ;;  %vm331_vm5 = vcmp.gt.f32.partialorder %v327_v43, 0.0 }
 0x1df   :  { %v332_v47 = vmin.f32 %v322_v45, 0.0  ;;  %vm330_vm4 = vcmp.gt.f32.partialorder %v322_v45, 0.0 }
 0x1e0   :  { %v336_v48 = vmul.f32 1.442695, %v333_v46 }
 0x1e1   :  { %v334_v49 = vmul.f32 1.442695, %v332_v47 }
 0x1e2   :  { %1037 = vpow2.f32 %v336_v48 }
 0x1e3   :  { %1039 = vpow2.f32 %v334_v49 }
 0x1ec   :  { %v1038_v50 = vpop.eup %1037 }
 0x1ed   :  { %v1040_v51 = vpop.eup %1039  ;;  %v823_v52 = vadd.f32 -1.0, %v1038_v50 }
 0x1ee   :  { %v822_v53 = vadd.f32 -1.0, %v1040_v51 }
 0x1ef   :  { %v341_v55 = vsel %vm331_vm5, %v327_v43, %v823_v52 }
 0x1f0   :  { %v340_v54 = vsel %vm330_vm4, %v322_v45, %v822_v53 }
 0x1f1   :  { %935 = vmatprep.mubr.msk.f32.mxu1 %vm140_vm1, %v340_v54 }
 0x1f2   :  { %936 = vmatmul.mubr.msk.f32.vlgmr.msra.gmra.mrb[2].mxu1 %vm140_vm1, %v341_v55 }
 0x1f3   :  { %1010 = vmatpush3.bf16.msra.mxu1 %v1007_v17 }
 0x1f4   :  { %1012 = vmatprep.subr.bf16.mxu1 %v1011_v20 }
 0x1f7   :  { %1014 = vmatpush3.bf16.msra.mxu1 %v1011_v20 }
 0x2c5   :  { %v937_v63 = vpop.f32.mrb[2].mxu1 }
 0x2c6   :  { %v433_v0 = vadd.f32 %v937_v63, %v829_v62  ;;  %v427_v1 = vpop.f32.mrb[3].mxu1 }
 0x2c7   :  { %v428_v2 = vadd.f32 %v829_v62, %v427_v1 }
 0x2c8   :  { %v437_v3 = vadd.f32 %v433_v0, %v237_v34 }
 0x2c9   :  { %v436_v4 = vadd.f32 %v428_v2, %v236_v33 }
 0x2ca   :  { %v441_v5 = vmin.f32 %v437_v3, 0.0  ;;  %vm439_vm7 = vcmp.gt.f32.partialorder %v437_v3, 0.0 }
 0x2cb   :  { %v440_v6 = vmin.f32 %v436_v4, 0.0  ;;  %vm438_vm6 = vcmp.gt.f32.partialorder %v436_v4, 0.0 }
 0x2cc   :  { %v444_v7 = vmul.f32 1.442695, %v441_v5 }
 0x2cd   :  { %v442_v8 = vmul.f32 1.442695, %v440_v6 }
 0x2ce   :  { %1041 = vpow2.f32 %v444_v7 }
 0x2cf   :  { %1043 = vpow2.f32 %v442_v8 }
 0x2d8   :  { %v1042_v9 = vpop.eup %1041 }
 0x2d9   :  { %v1044_v10 = vpop.eup %1043  ;;  %v833_v11 = vadd.f32 -1.0, %v1042_v9 }
 0x2da   :  { %v832_v12 = vadd.f32 -1.0, %v1044_v10 }
 0x2db   :  { %v449_v14 = vsel %vm439_vm7, %v437_v3, %v833_v11 }
 0x2dc   :  { %v448_v13 = vsel %vm438_vm6, %v436_v4, %v832_v12 }
 0x2dd   :  { %946 = vmatprep.mubr.msk.f32.mxu0 %vm140_vm1, %v448_v13 }
 0x2de   :  { %947 = vmatmul.mubr.msk.f32.vlgmr.msra.gmra.mrb[2].mxu0 %vm140_vm1, %v449_v14 }
 0x2df   :  { %1018 = vmatpush3.bf16.msra.mxu0 %v1015_v39 }
 0x2e0   :  { %1020 = vmatprep.subr.bf16.mxu0 %v1019_v41 }
 0x2e3   :  { %1022 = vmatpush3.bf16.msra.mxu0 %v1019_v41 }
 0x3b1   :  { %v948_v22 = vpop.f32.mrb[2].mxu0 }
 0x3b2   :  { %v541_v23 = vadd.f32 %v948_v22, %v839_v21  ;;  %v535_v24 = vpop.f32.mrb[3].mxu0 }
 0x3b3   :  { %v536_v25 = vadd.f32 %v839_v21, %v535_v24 }
 0x3b4   :  { %v547_v26 = vmin.f32 %v541_v23, 0.0  ;;  %vm545_vm9 = vcmp.gt.f32.partialorder %v541_v23, 0.0 }
 0x3b5   :  { %v546_v27 = vmin.f32 %v536_v25, 0.0  ;;  %vm544_vm8 = vcmp.gt.f32.partialorder %v536_v25, 0.0 }
 0x3b6   :  { %v550_v28 = vmul.f32 1.442695, %v547_v26 }
 0x3b7   :  { %v548_v29 = vmul.f32 1.442695, %v546_v27 }
 0x3b8   :  { %1045 = vpow2.f32 %v550_v28 }
 0x3b9   :  { %1047 = vpow2.f32 %v548_v29 }
 0x3c2   :  { %v1046_v30 = vpop.eup %1045 }
 0x3c3   :  { %v1048_v31 = vpop.eup %1047  ;;  %v843_v32 = vadd.f32 -1.0, %v1046_v30 }
 0x3c4   :  { %v842_v33 = vadd.f32 -1.0, %v1048_v31 }
 0x3c5   :  { %v555_v35 = vsel %vm545_vm9, %v541_v23, %v843_v32 }
 0x3c6   :  { %v554_v34 = vsel %vm544_vm8, %v536_v25, %v842_v33 }
 0x3c7   :  { %957 = vmatprep.mubr.msk.f32.mxu1 %vm140_vm1, %v554_v34 }
 0x3c8   :  { %958 = vmatmul.mubr.msk.f32.vlgmr.msra.gmra.mrb[4].mxu1 %vm140_vm1, %v555_v35 }
 0x49b   :  { %v959_v43 = vpop.f32.mrb[4].mxu1 }
 0x49c   :  { %v647_v44 = vadd.f32 %v959_v43, %v849_v42  ;;  %v641_v45 = vpop.f32.mrb[5].mxu1 }
 0x49d   :  { %v642_v46 = vadd.f32 %v849_v42, %v641_v45 }
 0x49e   :  { %v651_v47 = vadd.f32 %v647_v44, %v449_v14 }
 0x49f   :  { %v650_v48 = vadd.f32 %v642_v46, %v448_v13 }
 0x4a0   :  { %v655_v49 = vmin.f32 %v651_v47, 0.0  ;;  %vm653_vm11 = vcmp.gt.f32.partialorder %v651_v47, 0.0 }
 0x4a1   :  { %v654_v50 = vmin.f32 %v650_v48, 0.0  ;;  %vm652_vm10 = vcmp.gt.f32.partialorder %v650_v48, 0.0 }
 0x4a2   :  { %v658_v51 = vmul.f32 1.442695, %v655_v49 }
 0x4a3   :  { %v656_v52 = vmul.f32 1.442695, %v654_v50 }
 0x4a4   :  { %1049 = vpow2.f32 %v658_v51 }
 0x4a5   :  { %1051 = vpow2.f32 %v656_v52 }
 0x4ae   :  { %v1050_v53 = vpop.eup %1049 }
 0x4af   :  { %v1052_v54 = vpop.eup %1051  ;;  %v853_v55 = vadd.f32 -1.0, %v1050_v53 }
 0x4b0   :  { %v852_v56 = vadd.f32 -1.0, %v1052_v54 }
 0x4b1   :  { %v663_v58 = vsel %vm653_vm11, %v651_v47, %v853_v55 }
 0x4b2   :  { %v662_v57 = vsel %vm652_vm10, %v650_v48, %v852_v56 }
 0x4b3   :  { %968 = vmatprep.mubr.msk.f32.mxu0 %vm140_vm1, %v662_v57 }
 0x4b4   :  { %969 = vmatmul.mubr.msk.f32.vlgmr.msra.gmra.mrb[4].mxu0 %vm140_vm1, %v663_v58 }
 0x587   :  { %v970_v60 = vpop.f32.mrb[4].mxu0 }
 0x588   :  { %v753_v61 = vadd.f32 %v970_v60, %v854_v59  ;;  %v747_v62 = vpop.f32.mrb[5].mxu0 }
 0x589   :  { %v748_v63 = vadd.f32 %v854_v59, %v747_v62 }
 0x58a   :  { %v759_v0 = vsel %vm140_vm1, %v753_v61, 0.0  ;;  %v771_v1 = vmul.f32 %v753_v61, %v753_v61 }
 0x58b   :  { %v758_v2 = vsel %vm140_vm1, %v748_v63, 0.0  ;;  %v770_v3 = vmul.f32 %v748_v63, %v748_v63 }
 0x58c   :  { %v760_v4 = vadd.f32 %v759_v0, %v758_v2  ;;  %v773_v6 = vsel %vm140_vm1, %v771_v1, 0.0 }
 0x58d   :  { %v772_v5 = vsel %vm140_vm1, %v770_v3, 0.0 }
 0x58e   :  { %761 = vadd.xlane.f32.xlu0 %v760_v4  ;;  %v774_v7 = vadd.f32 %v773_v6, %v772_v5 }
 0x592   :  { %775 = vadd.xlane.f32.xlu0 %v774_v7 }
 0x61b   :  { %v762_v8 = vpop.xlane.xlu0 %761 }
 0x61c   :  { %v763_v9 = vrot.slane %v762_v8, 4 }
 0x61e   :  { %v764_v10 = vadd.f32 %v763_v9, %v762_v8 }
 0x61f   :  { %v776_v11 = vpop.xlane.xlu0 %775 }
 0x620   :  { %v765_v12 = vrot.slane %v764_v10, 2  ;;  %v777_v13 = vrot.slane %v776_v11, 4 }
 0x622   :  { %v778_v14 = vadd.f32 %v777_v13, %v776_v11  ;;  %v766_v15 = vadd.f32 %v765_v12, %v764_v10 }
 0x624   :  { %v779_v16 = vrot.slane %v778_v14, 2  ;;  %v767_v17 = vrot.slane %v766_v15, 1 }
 0x626   :  { %v780_v18 = vadd.f32 %v779_v16, %v778_v14  ;;  %v768_v19 = vadd.f32 %v767_v17, %v766_v15 }
 0x628   :  { %1025 = vpush %v768_v19  ;;  %v781_v20 = vrot.slane %v780_v18, 1 }
 0x62a   :  { %v782_v21 = vadd.f32 %v781_v20, %v780_v18 }
 0x62c   :  { %1027 = vpush %v782_v21 }
 0x659   :  { %s1026_s9 = spop %1025 }
 0x65a   :  { %s786_s14 = smul.f32 0.001953125, %s1026_s9 }
 0x65c   :  { %s790_s2 = smul.f32 %s786_s14, %s786_s14 }
 0x65d   :  { %s1028_s15 = spop %1027 }
 0x65e   :  { %s789_s16 = smul.f32 0.001953125, %s1028_s15 }
 0x660   :  { %s791_s17 = ssub.f32 %s789_s16, %s790_s2 }
 0x662   :  { %s792_s19 = smax.f32 %s1070_s18, %s791_s17 }
 0x663   :  { %s793_s20 = sadd.f32 0.001, %s792_s19 }
 0x665   :  { %v794_v22 = vstv %s793_s20 }
 0x666   :  { %1053 = vrsqrt.f32 %v794_v22 }
 0x670   :  { %v1054_v23 = vpop.eup %1053 }
 0x671   :  { %1029 = vpush %v1054_v23 }
 0x6a2   :  { %s1030_s0 = spop %1029 }
 0x6a3   :  { %s797_s22 = smul.f32 %s1030_s0, %s756_s21 }
 0x6a5   :  { %s798_s23 = smul.f32 %s797_s22, %s786_s14  ;;  %v800_v24 = vstv %s797_s22 }
 0x6a6   :  { %v801_v25 = vmul.f32 %v800_v24, %v748_v63  ;;  %v802_v26 = vmul.f32 %v800_v24, %v753_v61 }
 0x6a7   :  { %s799_s3 = ssub.f32 %s857_s1, %s798_s23 }
 0x6a9   :  { %v803_v27 = vstv %s799_s3 }
 0x6aa   :  { %v804_v28 = vadd.f32 %v803_v27, %v801_v25  ;;  %v805_v29 = vadd.f32 %v803_v27, %v802_v26 }
 0x6ac   :  { %806 = vst.msk [vmem:[%s1274_s10] sm:$0xff] %vm140_vm1, %v804_v28  ;;  %807 = vst.msk [vmem:[%s1274_s10 + $0x8] sm:$0xff] %vm140_vm1, %v805_v29 }
 0x6ad   :  { %812 = vsyncpa [#allocation5], 1 }

</bundles_post_ra>
